<compile_context>
chip_gen: v7x
topology: tpu7x:2x2x1
jax: 0.10.0
libtpu: 0.0.40
codegen_flags: <defaults>
</compile_context>

<pallas_src>
import math
import functools

import jax
import jax.numpy as jnp
from jax.experimental import pallas as pl
from jax.experimental.pallas import tpu as pltpu


def _spatial_attention_kernel(x_ref, rmask_ref, fmask_ref, w_ref, bv_ref,
                              cntx_ref, attn_ref, *, dk, gamma):
    tb, n, d = x_ref.shape
    x = x_ref[...]                                    # (tb, n, d) f32
    w = w_ref[...]                                    # (d, 4*dk + d) f32

    # One wide MXU pass for all five projections (tb*n rows, 4*dk+d lanes).
    proj = jnp.dot(x.reshape(tb * n, d), w, preferred_element_type=jnp.float32)
    proj = proj.reshape(tb, n, 4 * dk + d)

    q_real = proj[..., 0 * dk:1 * dk]                 # 1/sqrt(dk) folded into W
    k_real = proj[..., 1 * dk:2 * dk]
    q_fake = proj[..., 2 * dk:3 * dk]
    k_fake = proj[..., 3 * dk:4 * dk]
    v = proj[..., 4 * dk:] + bv_ref[...]              # (tb, n, d) + (1, d)

    # Q @ K^T without materializing a transpose (contract last dims, batch b).
    s_real = jnp.einsum('bnd,bmd->bnm', q_real, k_real,
                        preferred_element_type=jnp.float32)
    s_fake = jnp.einsum('bnd,bmd->bnm', q_fake, k_fake,
                        preferred_element_type=jnp.float32)

    # In-kernel masked_fill_: int8 masks, VPU select (no wrapper-side bias).
    neg = jnp.float32(-1.0e9)
    s_real = jnp.where(rmask_ref[...] != 0, neg, s_real)
    s_fake = jnp.where(fmask_ref[...] != 0, neg, s_fake)

    # Shared per-row max (== torch's max_scores) for a numerically stable exp;
    # cancels exactly in the row normalization below.
    m = jnp.maximum(jnp.max(s_real, axis=-1, keepdims=True),
                    jnp.max(s_fake, axis=-1, keepdims=True))
    e_real = jnp.exp(s_real - m)
    e_fake = jnp.exp(s_fake - m)

    # 1/(1+gamma) dropped: it cancels in attn = scores / sum(scores).
    scores = e_real + gamma * e_fake

    denom = jnp.sum(scores, axis=-1, keepdims=True)
    # One reciprocal per row + broadcast multiply instead of N*N divisions.
    # NOTE: a row fully masked in BOTH graphs would make denom degenerate;
    # neither the torch reference nor this kernel guards against that.
    attn = scores * pl.reciprocal(denom, approx=False)

    cntx = jnp.einsum('bnm,bmd->bnd', attn, v,
                      preferred_element_type=jnp.float32)

    cntx_ref[...] = cntx
    attn_ref[...] = attn


def fuse_params(params):
    """One-time fusion of the five projection weights (hoisted out of forward).

    Folds the 1/sqrt(dk) score scale into the Q columns and concatenates
    [Wq_real*s | Wk_real | Wq_fake*s | Wk_fake | Wv] into one (d, 4*dk+d)
    matrix so the kernel needs a single resident weight block.
    """
    d = params["wv"].shape[0]
    dk = params["wq_real"].shape[1]
    inv = 1.0 / math.sqrt(dk)
    w_all = jnp.concatenate(
        [params["wq_real"] * inv, params["wk_real"],
         params["wq_fake"] * inv, params["wk_fake"],
         params["wv"]], axis=1).astype(jnp.float32)
    bv = params["bv"].reshape(1, d).astype(jnp.float32)
    return {"w_all": w_all, "bv": bv, "dk": dk}


def spatial_attention(x, real_edge_mask, fake_edge_mask, fused, gamma, *,
                      num_tiles=None):
    """Batched _SpatialAttention forward.  x: (B, N, d) or (N, d)."""
    squeeze = x.ndim == 2
    if squeeze:
        x = x[None]
        real_edge_mask = real_edge_mask[None]
        fake_edge_mask = fake_edge_mask[None]

    B, N, d = x.shape
    w_all = fused["w_all"]
    bv = fused["bv"]
    dk = fused["dk"]
    assert w_all.shape == (d, 4 * dk + d)

    # Masks travel as int8 (1 B/elem); the -1e9 fill happens inside the kernel.
    if real_edge_mask.dtype != jnp.int8:
        real_edge_mask = real_edge_mask.astype(jnp.int8)
    if fake_edge_mask.dtype != jnp.int8:
        fake_edge_mask = fake_edge_mask.astype(jnp.int8)

    # Tile selection: one big step unless splitting across 2 TCs (v7x) still
    # leaves >= 256 MXU rows per step.  For the small demo this gives grid=(1,).
    if num_tiles is None:
        num_tiles = 2 if (B % 2 == 0 and (B // 2) * N >= 256) else 1
    assert B % num_tiles == 0
    tb = B // num_tiles

    act_spec = pl.BlockSpec((tb, N, d), lambda b: (b, 0, 0))
    msk_spec = pl.BlockSpec((tb, N, N), lambda b: (b, 0, 0))
    # Constant index_map -> weights stay VMEM resident (no per-step re-DMA).
    w_spec = pl.BlockSpec((d, 4 * dk + d), lambda b: (0, 0))
    b_spec = pl.BlockSpec((1, d), lambda b: (0, 0))

    cntx, attn = pl.pallas_call(
        functools.partial(_spatial_attention_kernel, dk=dk, gamma=float(gamma)),
        grid=(num_tiles,),
        in_specs=[act_spec, msk_spec, msk_spec, w_spec, b_spec],
        out_specs=(pl.BlockSpec((tb, N, d), lambda b: (b, 0, 0)),
                   pl.BlockSpec((tb, N, N), lambda b: (b, 0, 0))),
        out_shape=(jax.ShapeDtypeStruct((B, N, d), jnp.float32),
                   jax.ShapeDtypeStruct((B, N, N), jnp.float32)),
        compiler_params=pltpu.CompilerParams(
            dimension_semantics=("parallel",),        # shard batch tiles on v7x
            vmem_limit_bytes=48 * 1024 * 1024),       # within v7x 64 MiB/TC
    )(x, real_edge_mask, fake_edge_mask, w_all, bv)

    if squeeze:
        return cntx[0], attn[0]
    return cntx, attn


def _init_params(key, d_model, attn_hidden_dim):
    ks = jax.random.split(key, 6)

    def lin(k, fan_in, fan_out):
        bound = 1.0 / math.sqrt(fan_in)
        return jax.random.uniform(k, (fan_in, fan_out), jnp.float32, -bound, bound)

    return {
        "wq_real": lin(ks[0], d_model, attn_hidden_dim),
        "wk_real": lin(ks[1], d_model, attn_hidden_dim),
        "wq_fake": lin(ks[2], d_model, attn_hidden_dim),
        "wk_fake": lin(ks[3], d_model, attn_hidden_dim),
        "wv":      lin(ks[4], d_model, d_model),
        "bv":      jax.random.uniform(ks[5], (d_model,), jnp.float32,
                                      -1.0 / math.sqrt(d_model),
                                      1.0 / math.sqrt(d_model)),
    }


def _reference(x, real_mask, fake_mask, params, gamma):
    """Pure-JAX reference mirroring the PyTorch forward exactly (per instance)."""
    dk = params["wq_real"].shape[1]

    def one(xi, rm, fm):
        q_real = xi @ params["wq_real"]
        k_real = xi @ params["wk_real"]
        q_fake = xi @ params["wq_fake"]
        k_fake = xi @ params["wk_fake"]
        v = xi @ params["wv"] + params["bv"]
        s_real = (q_real @ k_real.T) / math.sqrt(dk)
        s_real = jnp.where(rm, -1000000000.0, s_real)
        s_fake = (q_fake @ k_fake.T) / math.sqrt(dk)
        s_fake = jnp.where(fm, -1000000000.0, s_fake)
        # (max_scores in the torch code is computed but never used.)
        e_real = jnp.exp(s_real) / (1.0 + gamma)
        e_fake = gamma * jnp.exp(s_fake) / (1.0 + gamma)
        s = e_real + e_fake
        attn = s / jnp.sum(s, axis=-1, keepdims=True)
        return attn @ v, attn

    return jax.vmap(one)(x, real_mask, fake_mask)


if __name__ == "__main__":
    B = 8                 # batch of cell neighborhoods
    N = 8                 # tokens (cells) per neighborhood
    d_model = 128         # lane-dense feature dim
    attn_hidden_dim = 128
    gamma = 0.5

    key = jax.random.PRNGKey(0)
    kx, km, kp = jax.random.split(key, 3)

    x = jax.random.normal(kx, (B, N, d_model), jnp.float32)
    real_edge_mask = jax.random.bernoulli(km, 0.3, (B, N, N))   # True => masked
    fake_edge_mask = jnp.logical_not(real_edge_mask)            # complementary graph

    params = _init_params(kp, d_model, attn_hidden_dim)
    fused = fuse_params(params)   # hoisted: runs once, not per forward call

    cntx, attn = spatial_attention(x, real_edge_mask, fake_edge_mask, fused, gamma)
    cntx, attn = jax.block_until_ready((cntx, attn))

    ref_cntx, ref_attn = _reference(x, real_edge_mask, fake_edge_mask, params, gamma)

    assert cntx.shape == (B, N, d_model)
    assert attn.shape == (B, N, N)
    assert jnp.allclose(attn, ref_attn, rtol=1e-4, atol=1e-5), "attn mismatch"
    assert jnp.allclose(cntx, ref_cntx, rtol=1e-4, atol=1e-4), "cntx mismatch"

    print("KERNEL_OK")
</pallas_src>

<mosaic_0001>
module attributes {stable_mosaic.version = 11 : i64} {
  func.func @_spatial_attention_kernel(%arg0: i32, %arg1: memref<8x8x128xf32, #tpu.memory_space<vmem>>, %arg2: memref<8x8x8xi8, #tpu.memory_space<vmem>>, %arg3: memref<8x8x8xi8, #tpu.memory_space<vmem>>, %arg4: memref<128x640xf32, #tpu.memory_space<vmem>>, %arg5: memref<1x128xf32, #tpu.memory_space<vmem>>, %arg6: memref<8x8x128xf32, #tpu.memory_space<vmem>>, %arg7: memref<8x8x8xf32, #tpu.memory_space<vmem>>) attributes {dimension_semantics = [#tpu.dimension_semantics<parallel>], iteration_bounds = array<i64: 1>, scalar_prefetch = 0 : i64, scratch_operands = 0 : i64, tpu.core_type = #tpu.core_type<tc>, window_params = [{transform_indices = @transform_0, window_bounds = array<i64: 8, 8, 128>}, {transform_indices = @transform_1, window_bounds = array<i64: 8, 8, 8>}, {transform_indices = @transform_2, window_bounds = array<i64: 8, 8, 8>}, {pipeline_mode = #tpu.pipeline_mode<synchronous>, transform_indices = @transform_3, window_bounds = array<i64: 128, 640>}, {pipeline_mode = #tpu.pipeline_mode<synchronous>, transform_indices = @transform_4, window_bounds = array<i64: 1, 128>}, {transform_indices = @transform_5, window_bounds = array<i64: 8, 8, 128>}, {transform_indices = @transform_6, window_bounds = array<i64: 8, 8, 8>}]} {
    %c0 = arith.constant 0 : index
    %c0_0 = arith.constant 0 : index
    %c0_1 = arith.constant 0 : index
    %0 = vector.load %arg1[%c0, %c0_0, %c0_1] : memref<8x8x128xf32, #tpu.memory_space<vmem>>, vector<8x8x128xf32>
    %c0_2 = arith.constant 0 : index
    %c0_3 = arith.constant 0 : index
    %1 = vector.load %arg4[%c0_2, %c0_3] : memref<128x640xf32, #tpu.memory_space<vmem>>, vector<128x640xf32>
    %2 = vector.shape_cast %0 : vector<8x8x128xf32> to vector<64x128xf32>
    %cst = arith.constant dense<0.000000e+00> : vector<64x640xf32>
    %3 = tpu.matmul %2, %1, %cst {dimension_numbers = #tpu.dot_dimension_numbers<[1], [0], [0], [1], [0, 0, 1, 1], [], []>} : vector<64x128xf32>, vector<128x640xf32>, vector<64x640xf32> -> vector<64x640xf32>
    %4 = vector.shape_cast %3 : vector<64x640xf32> to vector<8x8x640xf32>
    %5 = vector.extract_strided_slice %4 {offsets = [0, 0, 0], sizes = [8, 8, 128], strides = [1, 1, 1]} : vector<8x8x640xf32> to vector<8x8x128xf32>
    %6 = vector.extract_strided_slice %4 {offsets = [0, 0, 128], sizes = [8, 8, 128], strides = [1, 1, 1]} : vector<8x8x640xf32> to vector<8x8x128xf32>
    %7 = vector.extract_strided_slice %4 {offsets = [0, 0, 256], sizes = [8, 8, 128], strides = [1, 1, 1]} : vector<8x8x640xf32> to vector<8x8x128xf32>
    %8 = vector.extract_strided_slice %4 {offsets = [0, 0, 384], sizes = [8, 8, 128], strides = [1, 1, 1]} : vector<8x8x640xf32> to vector<8x8x128xf32>
    %9 = vector.extract_strided_slice %4 {offsets = [0, 0, 512], sizes = [8, 8, 128], strides = [1, 1, 1]} : vector<8x8x640xf32> to vector<8x8x128xf32>
    %c0_4 = arith.constant 0 : index
    %c0_5 = arith.constant 0 : index
    %10 = vector.load %arg5[%c0_4, %c0_5] : memref<1x128xf32, #tpu.memory_space<vmem>>, vector<1x128xf32>
    %11 = vector.shape_cast %10 : vector<1x128xf32> to vector<1x1x128xf32>
    %12 = vector.broadcast %11 : vector<1x1x128xf32> to vector<8x8x128xf32>
    %13 = arith.addf %9, %12 : vector<8x8x128xf32>
    "tpu.trace_start"() <{level = 10 : i32, message = "bnd,bmd->bnm"}> : () -> ()
    %cst_6 = arith.constant dense<0.000000e+00> : vector<8x8x8xf32>
    %14 = tpu.matmul %5, %6, %cst_6 {dimension_numbers = #tpu.dot_dimension_numbers<[2], [2], [1], [1], [0, 0, 0, 1, 1, 1], [0], [0]>} : vector<8x8x128xf32>, vector<8x8x128xf32>, vector<8x8x8xf32> -> vector<8x8x8xf32>
    %cst_7 = arith.constant dense<0.000000e+00> : vector<8x8x8xf32>
    %15 = tpu.matmul %7, %8, %cst_7 {dimension_numbers = #tpu.dot_dimension_numbers<[2], [2], [1], [1], [0, 0, 0, 1, 1, 1], [0], [0]>} : vector<8x8x128xf32>, vector<8x8x128xf32>, vector<8x8x8xf32> -> vector<8x8x8xf32>
    "tpu.trace_stop"() : () -> ()
    %c0_8 = arith.constant 0 : index
    %c0_9 = arith.constant 0 : index
    %c0_10 = arith.constant 0 : index
    %16 = vector.load %arg2[%c0_8, %c0_9, %c0_10] : memref<8x8x8xi8, #tpu.memory_space<vmem>>, vector<8x8x8xi8>
    %c0_i8 = arith.constant 0 : i8
    %17 = vector.broadcast %c0_i8 : i8 to vector<8x8x8xi8>
    %18 = arith.cmpi ne, %16, %17 : vector<8x8x8xi8>
    %cst_11 = arith.constant -1.000000e+09 : f32
    %19 = vector.broadcast %cst_11 : f32 to vector<8x8x8xf32>
    %20 = arith.select %18, %19, %14 : vector<8x8x8xi1>, vector<8x8x8xf32>
    %c0_12 = arith.constant 0 : index
    %c0_13 = arith.constant 0 : index
    %c0_14 = arith.constant 0 : index
    %21 = vector.load %arg3[%c0_12, %c0_13, %c0_14] : memref<8x8x8xi8, #tpu.memory_space<vmem>>, vector<8x8x8xi8>
    %c0_i8_15 = arith.constant 0 : i8
    %22 = vector.broadcast %c0_i8_15 : i8 to vector<8x8x8xi8>
    %23 = arith.cmpi ne, %21, %22 : vector<8x8x8xi8>
    %cst_16 = arith.constant -1.000000e+09 : f32
    %24 = vector.broadcast %cst_16 : f32 to vector<8x8x8xf32>
    %25 = arith.select %23, %24, %15 : vector<8x8x8xi1>, vector<8x8x8xf32>
    %cst_17 = arith.constant dense<0xFF800000> : vector<8x8xf32>
    %26 = vector.multi_reduction <maximumf>, %20, %cst_17 [2] : vector<8x8x8xf32> to vector<8x8xf32>
    %27 = vector.shape_cast %26 : vector<8x8xf32> to vector<8x8x1xf32>
    %cst_18 = arith.constant dense<0xFF800000> : vector<8x8xf32>
    %28 = vector.multi_reduction <maximumf>, %25, %cst_18 [2] : vector<8x8x8xf32> to vector<8x8xf32>
    %29 = vector.shape_cast %28 : vector<8x8xf32> to vector<8x8x1xf32>
    %30 = arith.maximumf %27, %29 : vector<8x8x1xf32>
    %31 = vector.broadcast %30 : vector<8x8x1xf32> to vector<8x8x8xf32>
    %32 = arith.subf %20, %31 : vector<8x8x8xf32>
    %33 = math.exp %32 : vector<8x8x8xf32>
    %34 = vector.broadcast %30 : vector<8x8x1xf32> to vector<8x8x8xf32>
    %35 = arith.subf %25, %34 : vector<8x8x8xf32>
    %36 = math.exp %35 : vector<8x8x8xf32>
    %cst_19 = arith.constant 5.000000e-01 : f32
    %37 = vector.broadcast %cst_19 : f32 to vector<8x8x8xf32>
    %38 = arith.mulf %37, %36 : vector<8x8x8xf32>
    %39 = arith.addf %33, %38 : vector<8x8x8xf32>
    %cst_20 = arith.constant dense<0.000000e+00> : vector<8x8xf32>
    %40 = vector.multi_reduction <add>, %39, %cst_20 [2] : vector<8x8x8xf32> to vector<8x8xf32>
    %41 = vector.shape_cast %40 : vector<8x8xf32> to vector<8x8x1xf32>
    %42 = tpu.reciprocal %41 : vector<8x8x1xf32> -> vector<8x8x1xf32>
    %43 = vector.broadcast %42 : vector<8x8x1xf32> to vector<8x8x8xf32>
    %44 = arith.mulf %39, %43 : vector<8x8x8xf32>
    "tpu.trace_start"() <{level = 10 : i32, message = "bnm,bmd->bnd"}> : () -> ()
    %cst_21 = arith.constant dense<0.000000e+00> : vector<8x8x128xf32>
    %45 = tpu.matmul %44, %13, %cst_21 {dimension_numbers = #tpu.dot_dimension_numbers<[2], [1], [1], [2], [0, 0, 0, 1, 1, 2], [0], [0]>} : vector<8x8x8xf32>, vector<8x8x128xf32>, vector<8x8x128xf32> -> vector<8x8x128xf32>
    "tpu.trace_stop"() : () -> ()
    %c0_22 = arith.constant 0 : index
    %c0_23 = arith.constant 0 : index
    %c0_24 = arith.constant 0 : index
    %46 = vector.load %arg6[%c0_22, %c0_23, %c0_24] : memref<8x8x128xf32, #tpu.memory_space<vmem>>, vector<8x8x128xf32>
    tpu.vector_store %arg6[%c0_22, %c0_23, %c0_24], %45 {strides = array<i32>} : memref<8x8x128xf32, #tpu.memory_space<vmem>>, vector<8x8x128xf32>,
    %c0_25 = arith.constant 0 : index
    %c0_26 = arith.constant 0 : index
    %c0_27 = arith.constant 0 : index
    %47 = vector.load %arg7[%c0_25, %c0_26, %c0_27] : memref<8x8x8xf32, #tpu.memory_space<vmem>>, vector<8x8x8xf32>
    tpu.vector_store %arg7[%c0_25, %c0_26, %c0_27], %44 {strides = array<i32>} : memref<8x8x8xf32, #tpu.memory_space<vmem>>, vector<8x8x8xf32>,
    return
  }
  func.func @transform_0(%arg0: i32) -> (i32, i32, i32) {
    %c0_i32 = arith.constant 0 : i32
    %c0_i32_0 = arith.constant 0 : i32
    %c0_i32_1 = arith.constant 0 : i32
    return %arg0, %c0_i32, %c0_i32_0 : i32, i32, i32
  }
  func.func @transform_1(%arg0: i32) -> (i32, i32, i32) {
    %c0_i32 = arith.constant 0 : i32
    %c0_i32_0 = arith.constant 0 : i32
    %c0_i32_1 = arith.constant 0 : i32
    return %arg0, %c0_i32, %c0_i32_0 : i32, i32, i32
  }
  func.func @transform_2(%arg0: i32) -> (i32, i32, i32) {
    %c0_i32 = arith.constant 0 : i32
    %c0_i32_0 = arith.constant 0 : i32
    %c0_i32_1 = arith.constant 0 : i32
    return %arg0, %c0_i32, %c0_i32_0 : i32, i32, i32
  }
  func.func @transform_3(%arg0: i32) -> (i32, i32) {
    %c0_i32 = arith.constant 0 : i32
    %c0_i32_0 = arith.constant 0 : i32
    %c0_i32_1 = arith.constant 0 : i32
    return %c0_i32, %c0_i32_0 : i32, i32
  }
  func.func @transform_4(%arg0: i32) -> (i32, i32) {
    %c0_i32 = arith.constant 0 : i32
    %c0_i32_0 = arith.constant 0 : i32
    %c0_i32_1 = arith.constant 0 : i32
    return %c0_i32, %c0_i32_0 : i32, i32
  }
  func.func @transform_5(%arg0: i32) -> (i32, i32, i32) {
    %c0_i32 = arith.constant 0 : i32
    %c0_i32_0 = arith.constant 0 : i32
    %c0_i32_1 = arith.constant 0 : i32
    return %arg0, %c0_i32, %c0_i32_0 : i32, i32, i32
  }
  func.func @transform_6(%arg0: i32) -> (i32, i32, i32) {
    %c0_i32 = arith.constant 0 : i32
    %c0_i32_0 = arith.constant 0 : i32
    %c0_i32_1 = arith.constant 0 : i32
    return %arg0, %c0_i32, %c0_i32_0 : i32, i32, i32
  }
}

</mosaic_0001>

<bundles_post_ra>
// kernel: tpu_custom_call.1
= control target key start
LH: loop header
LB: loop body
LE: loop exit
PB: predicated region body
PF: predicated region fallthrough
CT: control target
= control target key end

     0   :  { %12 = vsyncpa [#allocation3], 0  ;;  %s3468_s0 = inlined_call_operand.hbm [shape: f32[8,8,128], index: 0, kind: input, shape index: {}]   ;;  %s3469_s1 = inlined_call_operand.hbm [shape: s8[8,8,8], index: 1, kind: input, shape index: {}]   ;;  %s3470_s2 = inlined_call_operand.hbm [shape: s8[8,8,8], index: 2, kind: input, shape index: {}]   ;;  %s3471_s3 = inlined_call_operand.hbm [shape: f32[128,640], index: 3, kind: input, shape index: {}]   ;;  %s3472_s4 = inlined_call_operand.vmem [shape: f32[1,128], index: 4, kind: input, shape index: {}]   ;;  %s3473_s5 = inlined_call_operand.hbm [shape: f32[8,8,128], index: 5, kind: output, shape index: {0}]   ;;  %s3474_s6 = inlined_call_operand.hbm [shape: f32[8,8,8], index: 6, kind: output, shape index: {1}]  }
   0x1   :  { %13 = vsyncpa [#allocation6], 0 }
   0x2   :  { %14 = vsyncpa [#allocation9], 0 }
   0x3   :  { %15 = vsyncpa [#allocation4], 0 }
   0x4   :  { %16 = vsyncpa [#allocation12], 0  ;;  %s3073_s21 = smov [#allocation5]   ;;  %s2931_s25 = scalar_lea.hbm %s3469_s1, 256 }
   0x5   :  { %s34_s22 = sshll.u32 %s3073_s21, 4  ;;  %p2932_p0 = scmp.ne.s32.totalorder %s3469_s1, %s2931_s25  ;;  %s35_s22 = int_to_ptr.vmem [resolvable:$true] %s34_s22 }
   0x6   :  { %p2935_p1 = scmp.lt.u32.totalorder %s2931_s25, %s3469_s1 }
   0x8   :  { %p2937_p2 = pnand %p2935_p1, %p2932_p0 }
   0xa   :  { %2940 = shalt.err (!%p2937_p2)
}
   0xb   :  { %s2941_s30 = scalar_lea.vmem %s35_s22, 256  ;;  %p2946_p4 = scmp.lt.s32.totalorder %s35_s22, %s35_s22 }
   0xc   :  { %p2942_p3 = scmp.ne.s32.totalorder %s35_s22, %s2941_s30  ;;  %p2947_p5 = scmp.lt.s32.totalorder %s2941_s30, %s2941_s30 }
   0xe   :  { %p2948_p6 = por %p2947_p5, %p2946_p4 }
  0x10   :  { %p2949_p7 = pnand %p2948_p6, %p2942_p3 }
  0x12   :  { %2952 = shalt.err (!%p2949_p7)
}
  0x13   :  { %s3074_s7 = smov 32   ;;  %s3075_s8 = smov 2  }
  0x14   :  { %40 = dma.hbm_to_vmem [thread:$0]  %s3469_s1, 256, %s35_s22, [#allocation6], %s3074_s7, %s3074_s7, %s3075_s8  }
  0x15   :  { %s3076_s11 = smov [#allocation2]   ;;  %s2953_s15 = scalar_lea.hbm %s3468_s0, 1024 }
  0x16   :  { %s22_s12 = sshll.u32 %s3076_s11, 4  ;;  %p2954_p8 = scmp.ne.s32.totalorder %s3468_s0, %s2953_s15  ;;  %s23_s12 = int_to_ptr.vmem [resolvable:$true] %s22_s12 }
  0x17   :  { %p2957_p9 = scmp.lt.u32.totalorder %s2953_s15, %s3468_s0 }
  0x19   :  { %p2959_p10 = pnand %p2957_p9, %p2954_p8 }
  0x1b   :  { %2962 = shalt.err (!%p2959_p10)
}
  0x1c   :  { %s2963_s20 = scalar_lea.vmem %s23_s12, 1024  ;;  %p2968_p12 = scmp.lt.s32.totalorder %s23_s12, %s23_s12 }
  0x1d   :  { %p2964_p11 = scmp.ne.s32.totalorder %s23_s12, %s2963_s20  ;;  %p2969_p13 = scmp.lt.s32.totalorder %s2963_s20, %s2963_s20 }
  0x1f   :  { %p2970_p0 = por %p2969_p13, %p2968_p12 }
  0x21   :  { %p2971_p1 = pnand %p2970_p0, %p2964_p11 }
  0x23   :  { %2974 = shalt.err (!%p2971_p1)
}
  0x24   :  { %s3077_s1 = smov 128   ;;  %s3078_s21 = smov 8  }
  0x25   :  { %28 = dma.hbm_to_vmem [thread:$0]  %s3468_s0, 1024, %s23_s12, [#allocation3], %s3077_s1, %s3077_s1, %s3078_s21  }
  0x26   :  { %s3079_s24 = smov [#allocation7]   ;;  %s3080_s26 = smov [#allocation8]  }
  0x27   :  { %s46_s25 = sshll.u32 %s3079_s24, 4  ;;  %s58_s27 = sshll.u32 %s3080_s26, 4  ;;  %s47_s25 = int_to_ptr.vmem [resolvable:$true] %s46_s25  ;;  %s3153_s27 = int_to_ptr.vmem [resolvable:$true] %s58_s27 }
  0x28   :  { %s2975_s30 = scalar_lea.hbm %s3470_s2, 256 }
  0x29   :  { %p2976_p2 = scmp.ne.s32.totalorder %s3470_s2, %s2975_s30  ;;  %p2979_p3 = scmp.lt.u32.totalorder %s2975_s30, %s3470_s2 }
  0x2b   :  { %p2981_p4 = pnand %p2979_p3, %p2976_p2 }
  0x2d   :  { %2984 = shalt.err (!%p2981_p4)
}
  0x2e   :  { %s2985_s0 = scalar_lea.vmem %s47_s25, 256  ;;  %p2990_p6 = scmp.lt.s32.totalorder %s47_s25, %s47_s25 }
  0x2f   :  { %p2986_p5 = scmp.ne.s32.totalorder %s47_s25, %s2985_s0  ;;  %p2991_p7 = scmp.lt.s32.totalorder %s2985_s0, %s2985_s0 }
  0x31   :  { %p2992_p8 = por %p2991_p7, %p2990_p6 }
  0x33   :  { %p2993_p9 = pnand %p2992_p8, %p2986_p5 }
  0x35   :  { %2996 = shalt.err (!%p2993_p9)
}
  0x36   :  { %52 = dma.hbm_to_vmem [thread:$0]  %s3470_s2, 256, %s47_s25, [#allocation6], %s3074_s7, %s3074_s7, %s3075_s8  }
  0x37   :  { %s2997_s17 = scalar_lea.hbm %s3471_s3, 10240 }
  0x38   :  { %p2998_p10 = scmp.ne.s32.totalorder %s3471_s3, %s2997_s17  ;;  %p3001_p11 = scmp.lt.u32.totalorder %s2997_s17, %s3471_s3 }
  0x3a   :  { %p3003_p12 = pnand %p3001_p11, %p2998_p10 }
  0x3c   :  { %3006 = shalt.err (!%p3003_p12)
}
  0x3d   :  { %s3007_s23 = scalar_lea.vmem %s3153_s27, 10240  ;;  %p3012_p0 = scmp.lt.s32.totalorder %s3153_s27, %s3153_s27 }
  0x3e   :  { %p3008_p13 = scmp.ne.s32.totalorder %s3153_s27, %s3007_s23  ;;  %p3013_p1 = scmp.lt.s32.totalorder %s3007_s23, %s3007_s23 }
  0x40   :  { %p3014_p2 = por %p3013_p1, %p3012_p0 }
  0x42   :  { %p3015_p3 = pnand %p3014_p2, %p3008_p13 }
  0x44   :  { %3018 = shalt.err (!%p3015_p3)
}
  0x45   :  { %s3081_s2 = smov 640   ;;  %s3082_s7 = smov 40  }
  0x46   :  { %64 = dma.hbm_to_vmem [thread:$0]  %s3471_s3, 10240, %s3153_s27, [#allocation9], %s3081_s2, %s3081_s2, %s3082_s7  }
  0x47   :  { %3063 = dma.done.wait [#allocation3], 1024  }
  0x48   :  { %3064 = vsyncadd [#allocation3], 4294966272 }
  0x49   :  { %3065 = dma.done.wait [#allocation6], 512  }
  0x4a   :  { %3066 = vsyncadd [#allocation6], 4294966784 }
  0x4b   :  { %3067 = dma.done.wait [#allocation9], 10240  }
  0x4c   :  { %3068 = vsyncadd [#allocation9], 4294957056  ;;  %v3083_v0 = vmov 0.0   ;;  %v90_v1 = vld [vmem:[#allocation8 + $0x8] sm:$0xff]  ;;  %v95_v2 = vld [vmem:[#allocation8 + $0x30] sm:$0xff]  ;;  %vm3084_vm0 = vmmov 0  }
  0x4d   :  { %233 = vmatprep.mubr.f32.mxu0 %v3083_v0  ;;  %346 = vmatprep.mubr.f32.mxu1 %v3083_v0  ;;  %v89_v3 = vld [vmem:[#allocation8] sm:$0xff]  ;;  %v2772_v4 = vpack.c.bf16 %v95_v2, %v90_v1  ;;  %v94_v5 = vld [vmem:[#allocation8 + $0x28] sm:$0xff]  ;;  %v100_v6 = vld [vmem:[#allocation8 + $0x58] sm:$0xff]  ;;  %vm1731_vm5 = vcmask 64512  }
  0x4e   :  { %v105_v7 = vld [vmem:[#allocation8 + $0x80] sm:$0xff]  ;;  %v2774_v8 = vpack.c.bf16 %v94_v5, %v89_v3  ;;  %v99_v10 = vld [vmem:[#allocation8 + $0x50] sm:$0xff]  ;;  %v104_v11 = vld [vmem:[#allocation8 + $0x78] sm:$0xff] }
  0x4f   :  { %v2776_v9 = vpack.c.bf16 %v105_v7, %v100_v6  ;;  %v110_v12 = vld [vmem:[#allocation8 + $0xa8] sm:$0xff]  ;;  %2773 = vmatprep.subr.bf16.mxu0 %v2772_v4  ;;  %v115_v13 = vld [vmem:[#allocation8 + $0xd0] sm:$0xff]  ;;  %v2778_v14 = vpack.c.bf16 %v104_v11, %v99_v10  ;;  %v109_v16 = vld [vmem:[#allocation8 + $0xa0] sm:$0xff] }
  0x50   :  { %2775 = vmatpush1.bf16.msra.mxu0 %v2774_v8  ;;  %v2780_v15 = vpack.c.bf16 %v115_v13, %v110_v12  ;;  %v114_v17 = vld [vmem:[#allocation8 + $0xc8] sm:$0xff]  ;;  %v120_v18 = vld [vmem:[#allocation8 + $0xf8] sm:$0xff]  ;;  %v125_v19 = vld [vmem:[#allocation8 + $0x120] sm:$0xff] }
  0x51   :  { %2777 = vmatprep.subr.bf16.mxu0 %v2776_v9  ;;  %v92_v20 = vld [vmem:[#allocation8 + $0x18] sm:$0xff]  ;;  %v97_v21 = vld [vmem:[#allocation8 + $0x40] sm:$0xff]  ;;  %v91_v23 = vld [vmem:[#allocation8 + $0x10] sm:$0xff]  ;;  %v2782_v25 = vpack.c.bf16 %v114_v17, %v109_v16  ;;  %v2784_v29 = vpack.c.bf16 %v125_v19, %v120_v18 }
  0x52   :  { %v2804_v22 = vpack.c.bf16 %v97_v21, %v92_v20  ;;  %v96_v24 = vld [vmem:[#allocation8 + $0x38] sm:$0xff]  ;;  %v119_v26 = vld [vmem:[#allocation8 + $0xf0] sm:$0xff]  ;;  %v102_v28 = vld [vmem:[#allocation8 + $0x68] sm:$0xff] }
  0x53   :  { %v2806_v27 = vpack.c.bf16 %v96_v24, %v91_v23  ;;  %v124_v30 = vld [vmem:[#allocation8 + $0x118] sm:$0xff]  ;;  %v130_v31 = vld [vmem:[#allocation8 + $0x148] sm:$0xff]  ;;  %v107_v32 = vld [vmem:[#allocation8 + $0x90] sm:$0xff] }
  0x54   :  { %2779 = vmatpush1.bf16.msra.mxu0 %v2778_v14  ;;  %2805 = vmatprep.subr.bf16.mxu1 %v2804_v22  ;;  %v135_v33 = vld [vmem:[#allocation8 + $0x170] sm:$0xff]  ;;  %v2808_v34 = vpack.c.bf16 %v107_v32, %v102_v28  ;;  %v101_v35 = vld [vmem:[#allocation8 + $0x60] sm:$0xff]  ;;  %v106_v36 = vld [vmem:[#allocation8 + $0x88] sm:$0xff]  ;;  %v2786_v40 = vpack.c.bf16 %v124_v30, %v119_v26 }
  0x55   :  { %2781 = vmatprep.subr.bf16.mxu0 %v2780_v15  ;;  %2807 = vmatpush1.bf16.msra.mxu1 %v2806_v27  ;;  %v2810_v37 = vpack.c.bf16 %v106_v36, %v101_v35  ;;  %v112_v38 = vld [vmem:[#allocation8 + $0xb8] sm:$0xff]  ;;  %v117_v39 = vld [vmem:[#allocation8 + $0xe0] sm:$0xff]  ;;  %v111_v43 = vld [vmem:[#allocation8 + $0xb0] sm:$0xff]  ;;  %v2788_v44 = vpack.c.bf16 %v135_v33, %v130_v31 }
  0x56   :  { %v129_v41 = vld [vmem:[#allocation8 + $0x140] sm:$0xff]  ;;  %2809 = vmatprep.subr.bf16.mxu1 %v2808_v34  ;;  %v2812_v42 = vpack.c.bf16 %v117_v39, %v112_v38  ;;  %v134_v45 = vld [vmem:[#allocation8 + $0x168] sm:$0xff]  ;;  %v140_v46 = vld [vmem:[#allocation8 + $0x198] sm:$0xff] }
  0x57   :  { %v116_v47 = vld [vmem:[#allocation8 + $0xd8] sm:$0xff]  ;;  %v145_v48 = vld [vmem:[#allocation8 + $0x1c0] sm:$0xff]  ;;  %v122_v50 = vld [vmem:[#allocation8 + $0x108] sm:$0xff]  ;;  %v2790_v55 = vpack.c.bf16 %v134_v45, %v129_v41 }
  0x58   :  { %2783 = vmatpush1.bf16.msra.mxu0 %v2782_v25  ;;  %v2814_v49 = vpack.c.bf16 %v116_v47, %v111_v43  ;;  %v127_v51 = vld [vmem:[#allocation8 + $0x130] sm:$0xff]  ;;  %v121_v53 = vld [vmem:[#allocation8 + $0x100] sm:$0xff]  ;;  %v126_v54 = vld [vmem:[#allocation8 + $0x128] sm:$0xff]  ;;  %v2792_v58 = vpack.c.bf16 %v145_v48, %v140_v46 }
  0x59   :  { %2785 = vmatprep.subr.bf16.mxu0 %v2784_v29  ;;  %2811 = vmatpush1.bf16.msra.mxu1 %v2810_v37  ;;  %v2816_v52 = vpack.c.bf16 %v127_v51, %v122_v50  ;;  %v132_v56 = vld [vmem:[#allocation8 + $0x158] sm:$0xff]  ;;  %v137_v57 = vld [vmem:[#allocation8 + $0x180] sm:$0xff]  ;;  %v139_v59 = vld [vmem:[#allocation8 + $0x190] sm:$0xff]  ;;  %v2818_v63 = vpack.c.bf16 %v126_v54, %v121_v53 }
  0x5a   :  { %2813 = vmatprep.subr.bf16.mxu1 %v2812_v42  ;;  %v144_v60 = vld [vmem:[#allocation8 + $0x1b8] sm:$0xff]  ;;  %v150_v61 = vld [vmem:[#allocation8 + $0x1e8] sm:$0xff]  ;;  %v155_v62 = vld [vmem:[#allocation8 + $0x210] sm:$0xff]  ;;  %v2820_v1 = vpack.c.bf16 %v137_v57, %v132_v56 }
  0x5b   :  { %v131_v2 = vld [vmem:[#allocation8 + $0x150] sm:$0xff]  ;;  %v136_v3 = vld [vmem:[#allocation8 + $0x178] sm:$0xff]  ;;  %v2794_v4 = vpack.c.bf16 %v144_v60, %v139_v59  ;;  %v142_v5 = vld [vmem:[#allocation8 + $0x1a8] sm:$0xff]  ;;  %v2796_v7 = vpack.c.bf16 %v155_v62, %v150_v61 }
  0x5c   :  { %2787 = vmatpush1.bf16.msra.mxu0 %v2786_v40  ;;  %v147_v6 = vld [vmem:[#allocation8 + $0x1d0] sm:$0xff]  ;;  %v149_v8 = vld [vmem:[#allocation8 + $0x1e0] sm:$0xff]  ;;  %v154_v9 = vld [vmem:[#allocation8 + $0x208] sm:$0xff]  ;;  %v2822_v12 = vpack.c.bf16 %v136_v3, %v131_v2 }
  0x5d   :  { %2789 = vmatprep.subr.bf16.mxu0 %v2788_v44  ;;  %2815 = vmatpush1.bf16.msra.mxu1 %v2814_v49  ;;  %v160_v10 = vld [vmem:[#allocation8 + $0x238] sm:$0xff]  ;;  %v165_v11 = vld [vmem:[#allocation8 + $0x260] sm:$0xff]  ;;  %v2824_v13 = vpack.c.bf16 %v147_v6, %v142_v5  ;;  %v146_v15 = vld [vmem:[#allocation8 + $0x1c8] sm:$0xff]  ;;  %v2798_v16 = vpack.c.bf16 %v154_v9, %v149_v8 }
  0x5e   :  { %2817 = vmatprep.subr.bf16.mxu1 %v2816_v52  ;;  %v141_v14 = vld [vmem:[#allocation8 + $0x1a0] sm:$0xff]  ;;  %v152_v17 = vld [vmem:[#allocation8 + $0x1f8] sm:$0xff]  ;;  %v2800_v19 = vpack.c.bf16 %v165_v11, %v160_v10  ;;  %v159_v20 = vld [vmem:[#allocation8 + $0x230] sm:$0xff] }
  0x5f   :  { %v157_v18 = vld [vmem:[#allocation8 + $0x220] sm:$0xff]  ;;  %v164_v21 = vld [vmem:[#allocation8 + $0x258] sm:$0xff]  ;;  %v2826_v22 = vpack.c.bf16 %v146_v15, %v141_v14  ;;  %v98_v24 = vld [vmem:[#allocation8 + $0x48] sm:$0xff] }
  0x60   :  { %2791 = vmatpush1.bf16.msra.mxu0 %v2790_v55  ;;  %v93_v23 = vld [vmem:[#allocation8 + $0x20] sm:$0xff]  ;;  %v2828_v25 = vpack.c.bf16 %v157_v18, %v152_v17  ;;  %v151_v26 = vld [vmem:[#allocation8 + $0x1f0] sm:$0xff]  ;;  %v156_v27 = vld [vmem:[#allocation8 + $0x218] sm:$0xff]  ;;  %v2802_v28 = vpack.c.bf16 %v164_v21, %v159_v20 }
  0x61   :  { %2793 = vmatprep.subr.bf16.mxu0 %v2792_v58  ;;  %2819 = vmatpush1.bf16.msra.mxu1 %v2818_v63  ;;  %v162_v29 = vld [vmem:[#allocation8 + $0x248] sm:$0xff]  ;;  %v167_v30 = vld [vmem:[#allocation8 + $0x270] sm:$0xff]  ;;  %v2836_v31 = vpack.c.bf16 %v98_v24, %v93_v23  ;;  %v2830_v32 = vpack.c.bf16 %v156_v27, %v151_v26  ;;  %v108_v34 = vld [vmem:[#allocation8 + $0x98] sm:$0xff] }
  0x62   :  { %2821 = vmatprep.subr.bf16.mxu1 %v2820_v1  ;;  %v103_v33 = vld [vmem:[#allocation8 + $0x70] sm:$0xff]  ;;  %v2832_v35 = vpack.c.bf16 %v167_v30, %v162_v29  ;;  %v161_v36 = vld [vmem:[#allocation8 + $0x240] sm:$0xff]  ;;  %v166_v37 = vld [vmem:[#allocation8 + $0x268] sm:$0xff] }
  0x63   :  { %v3189_v38 = vld [vmem:[#allocation2] sm:$0xff]  ;;  %v2840_v39 = vpack.c.bf16 %v108_v34, %v103_v33  ;;  %v2834_v40 = vpack.c.bf16 %v166_v37, %v161_v36  ;;  %v118_v42 = vld [vmem:[#allocation8 + $0xe8] sm:$0xff]  ;;  %v123_v45 = vld [vmem:[#allocation8 + $0x110] sm:$0xff] }
  0x64   :  { %2795 = vmatpush1.bf16.msra.mxu0 %v2794_v4  ;;  %v113_v41 = vld [vmem:[#allocation8 + $0xc0] sm:$0xff]  ;;  %v3193_v43 = vld [vmem:[#allocation2 + $0x8] sm:$0xff]  ;;  %v128_v46 = vld [vmem:[#allocation8 + $0x138] sm:$0xff] }
  0x65   :  { %2797 = vmatprep.subr.bf16.mxu0 %v2796_v7  ;;  %2823 = vmatpush1.bf16.msra.mxu1 %v2822_v12  ;;  %v2844_v44 = vpack.c.bf16 %v118_v42, %v113_v41  ;;  %v83_v47 = vld [vmem:[#allocation2 + $0x10] sm:$0xff]  ;;  %v2848_v48 = vpack.c.bf16 %v128_v46, %v123_v45  ;;  %v133_v49 = vld [vmem:[#allocation8 + $0x160] sm:$0xff]  ;;  %v138_v50 = vld [vmem:[#allocation8 + $0x188] sm:$0xff] }
  0x66   :  { %2825 = vmatprep.subr.bf16.mxu1 %v2824_v13  ;;  %v84_v51 = vld [vmem:[#allocation2 + $0x18] sm:$0xff]  ;;  %v2852_v52 = vpack.c.bf16 %v138_v50, %v133_v49  ;;  %v143_v53 = vld [vmem:[#allocation8 + $0x1b0] sm:$0xff]  ;;  %v85_v55 = vld [vmem:[#allocation2 + $0x20] sm:$0xff] }
  0x67   :  { %v148_v54 = vld [vmem:[#allocation8 + $0x1d8] sm:$0xff]  ;;  %v86_v57 = vld [vmem:[#allocation2 + $0x28] sm:$0xff]  ;;  %v87_v58 = vld [vmem:[#allocation2 + $0x30] sm:$0xff] }
  0x68   :  { %2799 = vmatpush1.bf16.msra.mxu0 %v2798_v16  ;;  %v2856_v56 = vpack.c.bf16 %v148_v54, %v143_v53  ;;  %v88_v59 = vld [vmem:[#allocation2 + $0x38] sm:$0xff]  ;;  %v153_v60 = vld [vmem:[#allocation8 + $0x200] sm:$0xff]  ;;  %v158_v61 = vld [vmem:[#allocation8 + $0x228] sm:$0xff]  ;;  %v3085_v54 = vmov 0  }
  0x69   :  { %2801 = vmatprep.subr.bf16.mxu0 %v2800_v19  ;;  %2827 = vmatpush1.bf16.msra.mxu1 %v2826_v22  ;;  %v2860_v62 = vpack.c.bf16 %v158_v61, %v153_v60  ;;  %v163_v63 = vld [vmem:[#allocation8 + $0x250] sm:$0xff]  ;;  %v168_v1 = vld [vmem:[#allocation8 + $0x278] sm:$0xff]  ;;  %v2527_v36 = vld [vmem:[%s3472_s4] ss:$0 sm:$0xff]  ;;  %s3086_s4 = smov [#allocation11]  }
  0x6a   :  { %2829 = vmatprep.subr.bf16.mxu1 %v2828_v25  ;;  %v2864_v2 = vpack.c.bf16 %v168_v1, %v163_v63  ;;  %v1636_v53 = vld [vmem:[#allocation5 + $0x2] sm:$0x3]  ;;  %s2509_s26 = sshll.u32 %s3086_s4, 4  ;;  %s2510_s26 = int_to_ptr.vmem [resolvable:$true] %s2509_s26 }
  0x6b   :  { %vm1644_vm2 = vnez %v1636_v53  ;;  %v1689_v53 = vld [vmem:[#allocation7 + $0xc] sm:$0x3]  ;;  %s3019_s27 = scalar_lea.vmem %s2510_s26, 1024  ;;  %p3024_p5 = scmp.lt.s32.totalorder %s2510_s26, %s2510_s26 }
  0x6c   :  { %2803 = vmatpush1.bf16.msra.mxu0 %v2802_v28  ;;  %p3020_p4 = scmp.ne.s32.totalorder %s2510_s26, %s3019_s27  ;;  %p3025_p6 = scmp.lt.s32.totalorder %s3019_s27, %s3019_s27 }
  0x6d   :  { %2837 = vmatprep.subr.bf16.mxu0 %v2836_v31  ;;  %2831 = vmatpush1.bf16.msra.mxu1 %v2830_v32 }
  0x6e   :  { %2833 = vmatprep.subr.bf16.mxu1 %v2832_v35  ;;  %p3026_p7 = por %p3025_p6, %p3024_p5 }
  0x6f   :  { %234 = vmatmul.mubr.f32.vlgmr.msra.gmra.mrb[0].mxu0 %v3189_v38 }
  0x70   :  { %239 = vmatprep.mubr.f32.mxu0 %v3083_v0  ;;  %2839 = vmatpush3.bf16.msra.mxu0 %v2836_v31  ;;  %p3027_p8 = pnand %p3026_p7, %p3020_p4 }
  0x71   :  { %2841 = vmatprep.subr.bf16.mxu0 %v2840_v39  ;;  %2835 = vmatpush1.bf16.msra.mxu1 %v2834_v40 }
  0x72   :  { %2652 = vmatprep.subr.mxu1 %v3083_v0 }
  0x73   :  { %240 = vmatmul.mubr.f32.gmra.mrb[2].mxu0 %v3193_v43 }
  0x74   :  { %245 = vmatprep.mubr.f32.mxu0 %v3083_v0  ;;  %2843 = vmatpush3.bf16.msra.mxu0 %v2840_v39 }
  0x75   :  { %347 = vmatmul.mubr.f32.vlgmr.msra.gmra.mrb[0].mxu1 %v3189_v38  ;;  %2845 = vmatprep.subr.bf16.mxu0 %v2844_v44 }
  0x76   :  { %352 = vmatprep.mubr.f32.mxu1 %v3083_v0 }
  0x77   :  { %246 = vmatmul.mubr.f32.gmra.mrb[4].mxu0 %v83_v47 }
  0x78   :  { %251 = vmatprep.mubr.f32.mxu0 %v3083_v0  ;;  %2847 = vmatpush3.bf16.msra.mxu0 %v2844_v44 }
  0x79   :  { %353 = vmatmul.mubr.f32.gmra.mrb[2].mxu1 %v3193_v43  ;;  %2849 = vmatprep.subr.bf16.mxu0 %v2848_v48 }
  0x7a   :  { %358 = vmatprep.mubr.f32.mxu1 %v3083_v0 }
  0x7b   :  { %252 = vmatmul.mubr.f32.gmra.mrb[6].mxu0 %v84_v51 }
  0x7c   :  { %257 = vmatprep.mubr.f32.mxu0 %v3083_v0  ;;  %2851 = vmatpush3.bf16.msra.mxu0 %v2848_v48 }
  0x7d   :  { %359 = vmatmul.mubr.f32.gmra.mrb[4].mxu1 %v83_v47  ;;  %2853 = vmatprep.subr.bf16.mxu0 %v2852_v52 }
  0x7e   :  { %364 = vmatprep.mubr.f32.mxu1 %v3083_v0 }
  0x7f   :  { %258 = vmatmul.mubr.f32.gmra.mrb[8].mxu0 %v85_v55 }
  0x80   :  { %263 = vmatprep.mubr.f32.mxu0 %v3083_v0  ;;  %2855 = vmatpush3.bf16.msra.mxu0 %v2852_v52  ;;  %v1635_v52 = vld [vmem:[#allocation5] sm:$0x3] }
  0x81   :  { %365 = vmatmul.mubr.f32.gmra.mrb[6].mxu1 %v84_v51  ;;  %2857 = vmatprep.subr.bf16.mxu0 %v2856_v56  ;;  %vm1643_vm1 = vnez %v1635_v52 }
  0x82   :  { %370 = vmatprep.mubr.f32.mxu1 %v3083_v0 }
  0x83   :  { %264 = vmatmul.mubr.f32.gmra.mrb[10].mxu0 %v86_v57 }
  0x84   :  { %269 = vmatprep.mubr.f32.mxu0 %v3083_v0  ;;  %2859 = vmatpush3.bf16.msra.mxu0 %v2856_v56  ;;  %v1637_v56 = vld [vmem:[#allocation5 + $0x4] sm:$0x3] }
  0x85   :  { %371 = vmatmul.mubr.f32.gmra.mrb[8].mxu1 %v85_v55  ;;  %2861 = vmatprep.subr.bf16.mxu0 %v2860_v62  ;;  %vm1645_vm3 = vnez %v1637_v56 }
  0x86   :  { %376 = vmatprep.mubr.f32.mxu1 %v3083_v0  ;;  %v1653_v61 = vsel %vm1645_vm3, 16843009, %v3085_v54 }
  0x87   :  { %270 = vmatmul.mubr.f32.gmra.mrb[12].mxu0 %v87_v58 }
  0x88   :  { %275 = vmatprep.mubr.f32.mxu0 %v3083_v0  ;;  %2863 = vmatpush3.bf16.msra.mxu0 %v2860_v62 }
  0x89   :  { %377 = vmatmul.mubr.f32.gmra.mrb[10].mxu1 %v86_v57  ;;  %2865 = vmatprep.subr.bf16.mxu0 %v2864_v2 }
  0x8a   :  { %382 = vmatprep.mubr.f32.mxu1 %v3083_v0 }
  0x8b   :  { %276 = vmatmul.mubr.f32.gmra.mrb[14].mxu0 %v88_v59 }
  0x8c   :  { %2640 = vmatprep.mubr.f32.mxu0 %v3189_v38  ;;  %2867 = vmatpush3.bf16.msra.mxu0 %v2864_v2  ;;  %v1639_v2 = vld [vmem:[#allocation5 + $0x8] sm:$0x3] }
  0x8d   :  { %383 = vmatmul.mubr.f32.gmra.mrb[12].mxu1 %v87_v58  ;;  %2672 = vmatprep.subr.mxu0 %v3083_v0  ;;  %vm1647_vm8 = vnez %v1639_v2 }
  0x8e   :  { %388 = vmatprep.mubr.f32.mxu1 %v3083_v0 }
  0x8f   :  { %2641 = vmatmul.mubr.f32.vlgmr.msra.gmra.mrb[16].mxu0 %v3193_v43 }
  0x90   :  { %2643 = vmatprep.mubr.f32.mxu0 %v83_v47 }
  0x91   :  { %389 = vmatmul.mubr.f32.gmra.mrb[14].mxu1 %v88_v59 }
  0x92   :  { %2654 = vmatprep.mubr.msk.f32.mxu1 %vm3084_vm0, %v3083_v0 }
  0x93   :  { %2644 = vmatmul.mubr.f32.gmra.mrb[18].mxu0 %v84_v51 }
  0x94   :  { %2646 = vmatprep.mubr.f32.mxu0 %v85_v55  ;;  %v1651_v55 = vsel %vm1643_vm1, 16843009, %v3085_v54 }
  0x97   :  { %2647 = vmatmul.mubr.f32.gmra.mrb[20].mxu0 %v86_v57  ;;  %v1659_v57 = vunpack.c.0.s8 %v1651_v55 }
  0x98   :  { %2649 = vmatprep.mubr.f32.mxu0 %v87_v58  ;;  %v1652_v58 = vsel %vm1644_vm2, 16843009, %v3085_v54 }
  0x99   :  { %vm1667_vm4 = vcmp.ne.s32.totalorder %v1659_v57, 0  ;;  %v1660_v60 = vunpack.c.0.s8 %v1652_v58 }
  0x9b   :  { %2650 = vmatmul.mubr.f32.gmra.mrb[22].mxu0 %v88_v59  ;;  %v1638_v59 = vld [vmem:[#allocation5 + $0x6] sm:$0x3]  ;;  %vm1668_vm7 = vcmp.ne.s32.totalorder %v1660_v60, 0 }
  0x9c   :  { %2674 = vmatprep.mubr.msk.f32.mxu0 %vm3084_vm0, %v3083_v0  ;;  %vm1646_vm6 = vnez %v1638_v59 }
 0x142   :  { %v235_v3 = vpop.f32.mrb[0].mxu0 }
 0x143   :  { %v237_v4 = vpop.f32.mrb[1].mxu0 }
 0x144   :  { %2653 = vmatpush3.xpose.msra.mxu1 %v237_v4  ;;  %v1661_v4 = vunpack.c.0.s8 %v1653_v61  ;;  %v1688_v61 = vld [vmem:[#allocation7 + $0xa] sm:$0x3] }
 0x145   :  { %2657 = vmatprep.subr.mxu1 %v3083_v0 }
 0x146   :  { %v241_v5 = vpop.f32.mrb[2].mxu0  ;;  %vm1669_vm9 = vcmp.ne.s32.totalorder %v1661_v4, 0 }
 0x147   :  { %2655 = vmatmul.mubr.f32.vlgmr.msra.gmra.mrb[16].mxu1 %v235_v3  ;;  %v243_v6 = vpop.f32.mrb[3].mxu0 }
 0x148   :  { %2658 = vmatpush3.xpose.msra.mxu1 %v243_v6  ;;  %2659 = vmatprep.mubr.msk.f32.mxu1 %vm3084_vm0, %v3083_v0  ;;  %v348_v7 = vpop.f32.mrb[0].mxu1 }
 0x149   :  { %2662 = vmatprep.subr.mxu1 %v3083_v0  ;;  %v350_v8 = vpop.f32.mrb[1].mxu1 }
 0x14a   :  { %v247_v9 = vpop.f32.mrb[4].mxu0 }
 0x14b   :  { %v249_v10 = vpop.f32.mrb[5].mxu0  ;;  %2660 = vmatmul.mubr.f32.vlgmr.msra.gmra.mrb[18].mxu1 %v241_v5  ;;  %v1654_v5 = vsel %vm1646_vm6, 16843009, %v3085_v54 }
 0x14c   :  { %2663 = vmatpush3.xpose.msra.mxu1 %v249_v10  ;;  %2664 = vmatprep.mubr.msk.f32.mxu1 %vm3084_vm0, %v3083_v0  ;;  %v354_v11 = vpop.f32.mrb[2].mxu1 }
 0x14d   :  { %2667 = vmatprep.subr.mxu1 %v3083_v0  ;;  %v356_v12 = vpop.f32.mrb[3].mxu1 }
 0x14e   :  { %v253_v13 = vpop.f32.mrb[6].mxu0 }
 0x14f   :  { %v255_v14 = vpop.f32.mrb[7].mxu0  ;;  %2665 = vmatmul.mubr.f32.vlgmr.msra.gmra.mrb[20].mxu1 %v247_v9 }
 0x150   :  { %2668 = vmatpush3.xpose.msra.mxu1 %v255_v14  ;;  %2669 = vmatprep.mubr.msk.f32.mxu1 %vm3084_vm0, %v3083_v0  ;;  %v360_v15 = vpop.f32.mrb[4].mxu1 }
 0x151   :  { %2677 = vmatprep.subr.mxu1 %v3083_v0  ;;  %v362_v16 = vpop.f32.mrb[5].mxu1 }
 0x152   :  { %v259_v17 = vpop.f32.mrb[8].mxu0 }
 0x153   :  { %v261_v18 = vpop.f32.mrb[9].mxu0  ;;  %2670 = vmatmul.mubr.f32.vlgmr.msra.gmra.mrb[22].mxu1 %v253_v13 }
 0x154   :  { %2673 = vmatpush3.xpose.msra.mxu0 %v261_v18  ;;  %2679 = vmatprep.mubr.msk.f32.mxu1 %vm3084_vm0, %v3083_v0  ;;  %v366_v19 = vpop.f32.mrb[6].mxu1 }
 0x155   :  { %2682 = vmatprep.subr.mxu0 %v3083_v0  ;;  %v368_v20 = vpop.f32.mrb[7].mxu1 }
 0x156   :  { %v265_v21 = vpop.f32.mrb[10].mxu0 }
 0x157   :  { %v267_v22 = vpop.f32.mrb[11].mxu0  ;;  %2675 = vmatmul.mubr.f32.vlgmr.msra.gmra.mrb[24].mxu0 %v259_v17 }
 0x158   :  { %2678 = vmatpush3.xpose.msra.mxu1 %v267_v22  ;;  %2684 = vmatprep.mubr.msk.f32.mxu0 %vm3084_vm0, %v3083_v0  ;;  %v372_v23 = vpop.f32.mrb[8].mxu1 }
 0x159   :  { %2687 = vmatprep.subr.mxu1 %v3083_v0  ;;  %v374_v24 = vpop.f32.mrb[9].mxu1 }
 0x15a   :  { %v271_v25 = vpop.f32.mrb[12].mxu0 }
 0x15b   :  { %v273_v26 = vpop.f32.mrb[13].mxu0  ;;  %2680 = vmatmul.mubr.f32.vlgmr.msra.gmra.mrb[24].mxu1 %v265_v21  ;;  %v1683_v21 = vld [vmem:[#allocation7] sm:$0x3] }
 0x15c   :  { %2683 = vmatpush3.xpose.msra.mxu0 %v273_v26  ;;  %2689 = vmatprep.mubr.msk.f32.mxu1 %vm3084_vm0, %v3083_v0  ;;  %v378_v27 = vpop.f32.mrb[10].mxu1  ;;  %vm1691_vm14 = vnez %v1683_v21 }
 0x15d   :  { %2692 = vmatprep.subr.mxu0 %v3083_v0  ;;  %v380_v28 = vpop.f32.mrb[11].mxu1 }
 0x15e   :  { %v277_v29 = vpop.f32.mrb[14].mxu0 }
 0x15f   :  { %2685 = vmatmul.mubr.f32.vlgmr.msra.gmra.mrb[26].mxu0 %v271_v25  ;;  %v279_v30 = vpop.f32.mrb[15].mxu0 }
 0x160   :  { %2693 = vmatpush3.xpose.msra.mxu0 %v350_v8  ;;  %2694 = vmatprep.mubr.msk.f32.mxu0 %vm3084_vm0, %v3083_v0  ;;  %v384_v31 = vpop.f32.mrb[12].mxu1 }
 0x161   :  { %2702 = vmatprep.subr.mxu0 %v3083_v0  ;;  %2688 = vmatpush3.xpose.msra.mxu1 %v279_v30  ;;  %v386_v32 = vpop.f32.mrb[13].mxu1 }
 0x162   :  { %2697 = vmatprep.subr.mxu1 %v3083_v0  ;;  %v2642_v35 = vpop.f32.mrb[16].mxu0 }
 0x163   :  { %2695 = vmatmul.mubr.f32.vlgmr.msra.gmra.mrb[28].mxu0 %v348_v7  ;;  %v461_v37 = vpop.f32.mrb[17].mxu0  ;;  %v508_v38 = vadd.f32 %v2642_v35, %v2527_v36  ;;  %v1640_v7 = vld [vmem:[#allocation5 + $0xa] sm:$0x3]  ;;  %v1684_v35 = vld [vmem:[#allocation7 + $0x2] sm:$0x3] }
 0x164   :  { %2703 = vmatpush3.xpose.msra.mxu0 %v362_v16  ;;  %2704 = vmatprep.mubr.msk.f32.mxu0 %vm3084_vm0, %v3083_v0  ;;  %v390_v33 = vpop.f32.mrb[14].mxu1  ;;  %v507_v39 = vadd.f32 %v2527_v36, %v461_v37  ;;  %vm1648_vm10 = vnez %v1640_v7  ;;  %v1641_v16 = vld [vmem:[#allocation5 + $0xc] sm:$0x3]  ;;  %v1687_v37 = vld [vmem:[#allocation7 + $0x8] sm:$0x3] }
 0x165   :  { %2690 = vmatmul.mubr.f32.vlgmr.msra.gmra.mrb[26].mxu1 %v277_v29  ;;  %2712 = vmatprep.subr.mxu0 %v3083_v0  ;;  %v392_v34 = vpop.f32.mrb[15].mxu1  ;;  %vm1649_vm12 = vnez %v1641_v16  ;;  %vm1695_vm6 = vnez %v1687_v37 }
 0x166   :  { %2698 = vmatpush3.xpose.msra.mxu1 %v356_v12  ;;  %2699 = vmatprep.mubr.msk.f32.mxu1 %vm3084_vm0, %v3083_v0  ;;  %v2645_v40 = vpop.f32.mrb[18].mxu0  ;;  %v1655_v12 = vsel %vm1647_vm8, 16843009, %v3085_v54  ;;  %v1657_v26 = vsel %vm1649_vm12, 16843009, %v3085_v54  ;;  %vm1696_vm12 = vnez %v1688_v61 }
 0x167   :  { %2705 = vmatmul.mubr.f32.vlgmr.msra.gmra.mrb[30].mxu0 %v360_v15  ;;  %2707 = vmatprep.subr.mxu1 %v3083_v0  ;;  %v3270_v41 = vadd.f32 %v2645_v40, %v2527_v36  ;;  %v471_v42 = vpop.f32.mrb[19].mxu0  ;;  %v1663_v18 = vunpack.c.0.s8 %v1655_v12  ;;  %v1703_v60 = vsel %vm1695_vm6, 16843009, %v3085_v54  ;;  %v1690_v12 = vld [vmem:[#allocation7 + $0xe] sm:$0x3] }
 0x168   :  { %2713 = vmatpush3.xpose.msra.mxu0 %v374_v24  ;;  %2714 = vmatprep.mubr.msk.f32.mxu0 %vm3084_vm0, %v3083_v0  ;;  %v3274_v43 = vadd.f32 %v2527_v36, %v471_v42  ;;  %v1711_v4 = vunpack.c.0.s8 %v1703_v60 }
 0x169   :  { %2700 = vmatmul.mubr.f32.vlgmr.msra.gmra.mrb[28].mxu1 %v354_v11  ;;  %2722 = vmatprep.subr.mxu0 %v3083_v0  ;;  %v1662_v11 = vunpack.c.0.s8 %v1654_v5  ;;  %vm1671_vm13 = vcmp.ne.s32.totalorder %v1663_v18, 0  ;;  %v1704_v18 = vsel %vm1696_vm12, 16843009, %v3085_v54 }
 0x16a   :  { %2708 = vmatpush3.xpose.msra.mxu1 %v368_v20  ;;  %2709 = vmatprep.mubr.msk.f32.mxu1 %vm3084_vm0, %v3083_v0  ;;  %v2648_v44 = vpop.f32.mrb[20].mxu0 }
 0x16b   :  { %2715 = vmatmul.mubr.f32.vlgmr.msra.gmra.mrb[32].mxu0 %v372_v23  ;;  %2717 = vmatprep.subr.mxu1 %v3083_v0  ;;  %v3276_v45 = vadd.f32 %v2648_v44, %v2527_v36  ;;  %v481_v46 = vpop.f32.mrb[21].mxu0  ;;  %vm1670_vm11 = vcmp.ne.s32.totalorder %v1662_v11, 0 }
 0x16c   :  { %2723 = vmatpush3.xpose.msra.mxu0 %v386_v32  ;;  %2724 = vmatprep.mubr.msk.f32.mxu0 %vm3084_vm0, %v3083_v0  ;;  %v3278_v47 = vadd.f32 %v2527_v36, %v481_v46  ;;  %v1665_v32 = vunpack.c.0.s8 %v1657_v26 }
 0x16d   :  { %2710 = vmatmul.mubr.f32.vlgmr.msra.gmra.mrb[30].mxu1 %v366_v19  ;;  %2732 = vmatprep.subr.mxu0 %v3083_v0  ;;  %v1656_v19 = vsel %vm1648_vm10, 16843009, %v3085_v54 }
 0x16e   :  { %2718 = vmatpush3.xpose.msra.mxu1 %v380_v28  ;;  %2719 = vmatprep.mubr.msk.f32.mxu1 %vm3084_vm0, %v3083_v0  ;;  %v2651_v48 = vpop.f32.mrb[22].mxu0  ;;  %v1664_v24 = vunpack.c.0.s8 %v1656_v19  ;;  %vm1673_vm3 = vcmp.ne.s32.totalorder %v1665_v32, 0 }
 0x16f   :  { %2725 = vmatmul.mubr.f32.vlgmr.msra.gmra.mrb[34].mxu0 %v384_v31  ;;  %2727 = vmatprep.subr.mxu1 %v3083_v0  ;;  %v3280_v49 = vadd.f32 %v2651_v48, %v2527_v36  ;;  %v491_v50 = vpop.f32.mrb[23].mxu0  ;;  %v1685_v31 = vld [vmem:[#allocation7 + $0x4] sm:$0x3]  ;;  %v1686_v48 = vld [vmem:[#allocation7 + $0x6] sm:$0x3] }
 0x170   :  { %2734 = vmatprep.mubr.msk.f32.mxu0 %vm3084_vm0, %v3083_v0  ;;  %2733 = vmatpush3.msra.mxu0 %v507_v39  ;;  %v3282_v51 = vadd.f32 %v2527_v36, %v491_v50  ;;  %vm1672_vm15 = vcmp.ne.s32.totalorder %v1664_v24, 0  ;;  %vm1693_vm2 = vnez %v1685_v31  ;;  %vm1694_vm8 = vnez %v1686_v48 }
 0x171   :  { %2720 = vmatmul.mubr.f32.vlgmr.msra.gmra.mrb[32].mxu1 %v378_v27  ;;  %2742 = vmatprep.subr.mxu0 %v3083_v0  ;;  %v1642_v27 = vld [vmem:[#allocation5 + $0xe] sm:$0x3]  ;;  %v1701_v46 = vsel %vm1693_vm2, 16843009, %v3085_v54  ;;  %v1702_v5 = vsel %vm1694_vm8, 16843009, %v3085_v54 }
 0x172   :  { %2728 = vmatpush3.xpose.msra.mxu1 %v392_v34  ;;  %2729 = vmatprep.mubr.msk.f32.mxu1 %vm3084_vm0, %v3083_v0  ;;  %v1699_v34 = vsel %vm1691_vm14, 16843009, %v3085_v54  ;;  %vm1650_vm1 = vnez %v1642_v27  ;;  %v1709_v59 = vunpack.c.0.s8 %v1701_v46  ;;  %vm1719_vm14 = vcmp.ne.s32.totalorder %v1711_v4, 0 }
 0x173   :  { %2737 = vmatprep.subr.mxu1 %v3083_v0  ;;  %v1707_v39 = vunpack.c.0.s8 %v1699_v34  ;;  %v1658_v42 = vsel %vm1650_vm1, 16843009, %v3085_v54  ;;  %v1712_v27 = vunpack.c.0.s8 %v1704_v18 }
 0x174   :  { %v1666_v52 = vunpack.c.0.s8 %v1658_v42 }
 0x175   :  { %2730 = vmatmul.mubr.f32.vlgmr.msra.gmra.mrb[34].mxu1 %v390_v33 }
 0x176   :  { %2739 = vmatprep.mubr.msk.f32.mxu1 %vm3084_vm0, %v3083_v0  ;;  %2738 = vmatpush3.msra.mxu1 %v508_v38  ;;  %vm1674_vm10 = vcmp.ne.s32.totalorder %v1666_v52, 0 }
 0x177   :  { %2747 = vmatprep.subr.mxu1 %v3083_v0 }
 0x21a   :  { %v581_v62 = vpop.f32.mrb[16].mxu1 }
 0x21b   :  { %v3287_v63 = vsel %vm1667_vm4, -1e+09, %v581_v62  ;;  %v2656_v1 = vpop.f32.mrb[17].mxu1  ;;  %vm1692_vm4 = vnez %v1684_v35 }
 0x21c   :  { %v1732_v3 = vsel %vm1731_vm5, %v3287_v63, -inf  ;;  %v1700_v57 = vsel %vm1692_vm4, 16843009, %v3085_v54 }
 0x21d   :  { %1733 = vmax.xlane.f32.xlu0 %v1732_v3  ;;  %v1708_v1 = vunpack.c.0.s8 %v1700_v57 }
 0x21e   :  { %v651_v6 = vpop.f32.mrb[18].mxu1 }
 0x21f   :  { %v3292_v8 = vsel %vm1668_vm7, -1e+09, %v651_v6  ;;  %v2661_v9 = vpop.f32.mrb[19].mxu1  ;;  %vm1715_vm7 = vcmp.ne.s32.totalorder %v1707_v39, 0 }
 0x220   :  { %v1735_v10 = vsel %vm1731_vm5, %v3292_v8, -inf }
 0x221   :  { %1736 = vmax.xlane.f32.xlu0 %v1735_v10 }
 0x222   :  { %v721_v13 = vpop.f32.mrb[20].mxu1 }
 0x223   :  { %v3297_v14 = vsel %vm1669_vm9, -1e+09, %v721_v13  ;;  %v2666_v15 = vpop.f32.mrb[21].mxu1  ;;  %vm1697_vm9 = vnez %v1689_v53 }
 0x224   :  { %v1738_v17 = vsel %vm1731_vm5, %v3297_v14, -inf  ;;  %v1705_v9 = vsel %vm1697_vm9, 16843009, %v3085_v54  ;;  %v1710_v15 = vunpack.c.0.s8 %v1702_v5 }
 0x225   :  { %1739 = vmax.xlane.f32.xlu0 %v1738_v17 }
 0x226   :  { %v791_v20 = vpop.f32.mrb[22].mxu1  ;;  %vm1718_vm1 = vcmp.ne.s32.totalorder %v1710_v15, 0 }
 0x227   :  { %v3302_v22 = vsel %vm1670_vm11, -1e+09, %v791_v20  ;;  %v2671_v23 = vpop.f32.mrb[23].mxu1  ;;  %vm1717_vm11 = vcmp.ne.s32.totalorder %v1709_v59, 0 }
 0x228   :  { %v1741_v25 = vsel %vm1731_vm5, %v3302_v22, -inf  ;;  %v1713_v23 = vunpack.c.0.s8 %v1705_v9 }
 0x229   :  { %1742 = vmax.xlane.f32.xlu1 %v1741_v25 }
 0x22a   :  { %v861_v28 = vpop.f32.mrb[24].mxu0  ;;  %vm1721_vm2 = vcmp.ne.s32.totalorder %v1713_v23, 0 }
 0x22b   :  { %v3307_v29 = vsel %vm1671_vm13, -1e+09, %v861_v28  ;;  %v2676_v30 = vpop.f32.mrb[25].mxu0  ;;  %vm1716_vm13 = vcmp.ne.s32.totalorder %v1708_v1, 0 }
 0x22c   :  { %v1744_v33 = vsel %vm1731_vm5, %v3307_v29, -inf }
 0x22d   :  { %1745 = vmax.xlane.f32.xlu0 %v1744_v33 }
 0x22e   :  { %v931_v36 = vpop.f32.mrb[24].mxu1 }
 0x22f   :  { %v3312_v38 = vsel %vm1672_vm15, -1e+09, %v931_v36  ;;  %v2681_v40 = vpop.f32.mrb[25].mxu1  ;;  %vm1698_vm15 = vnez %v1690_v12 }
 0x230   :  { %v1747_v44 = vsel %vm1731_vm5, %v3312_v38, -inf  ;;  %v1706_v31 = vsel %vm1698_vm15, 16843009, %v3085_v54 }
 0x231   :  { %1748 = vmax.xlane.f32.xlu1 %v1747_v44  ;;  %v1714_v39 = vunpack.c.0.s8 %v1706_v31 }
 0x232   :  { %v1001_v50 = vpop.f32.mrb[26].mxu0 }
 0x233   :  { %v3318_v55 = vsel %vm1673_vm3, -1e+09, %v1001_v50  ;;  %v2686_v56 = vpop.f32.mrb[27].mxu0  ;;  %vm1720_vm3 = vcmp.ne.s32.totalorder %v1712_v27, 0  ;;  %vm1722_vm4 = vcmp.ne.s32.totalorder %v1714_v39, 0 }
 0x234   :  { %v1750_v58 = vsel %vm1731_vm5, %v3318_v55, -inf }
 0x235   :  { %1751 = vmax.xlane.f32.xlu0 %v1750_v58 }
 0x236   :  { %v1141_v62 = vpop.f32.mrb[28].mxu0 }
 0x237   :  { %v3324_v2 = vsel %vm1715_vm7, -1e+09, %v1141_v62  ;;  %v2696_v3 = vpop.f32.mrb[29].mxu0 }
 0x238   :  { %v1756_v6 = vsel %vm1731_vm5, %v3324_v2, -inf  ;;  %v1071_v7 = vpop.f32.mrb[26].mxu1 }
 0x239   :  { %1757 = vmax.xlane.f32.xlu1 %v1756_v6  ;;  %v3330_v10 = vsel %vm1674_vm10, -1e+09, %v1071_v7  ;;  %v2691_v11 = vpop.f32.mrb[27].mxu1 }
 0x23a   :  { %v1281_v13 = vpop.f32.mrb[30].mxu0  ;;  %v1753_v19 = vsel %vm1731_vm5, %v3330_v10, -inf }
 0x23b   :  { %v3332_v16 = vsel %vm1717_vm11, -1e+09, %v1281_v13  ;;  %v2706_v17 = vpop.f32.mrb[31].mxu0 }
 0x23c   :  { %v1762_v20 = vsel %vm1731_vm5, %v3332_v16, -inf  ;;  %v1211_v21 = vpop.f32.mrb[28].mxu1 }
 0x23d   :  { %1754 = vmax.xlane.f32.xlu1 %v1753_v19  ;;  %1763 = vmax.xlane.f32.xlu0 %v1762_v20  ;;  %v3339_v24 = vsel %vm1716_vm13, -1e+09, %v1211_v21  ;;  %v2701_v25 = vpop.f32.mrb[29].mxu1 }
 0x23e   :  { %v1421_v26 = vpop.f32.mrb[32].mxu0  ;;  %v1759_v32 = vsel %vm1731_vm5, %v3339_v24, -inf }
 0x23f   :  { %v3341_v28 = vsel %vm1719_vm14, -1e+09, %v1421_v26  ;;  %v2716_v30 = vpop.f32.mrb[33].mxu0 }
 0x240   :  { %v1768_v33 = vsel %vm1731_vm5, %v3341_v28, -inf  ;;  %v1351_v34 = vpop.f32.mrb[30].mxu1 }
 0x241   :  { %1760 = vmax.xlane.f32.xlu1 %v1759_v32  ;;  %1769 = vmax.xlane.f32.xlu0 %v1768_v33  ;;  %v3348_v35 = vsel %vm1718_vm1, -1e+09, %v1351_v34  ;;  %v2711_v36 = vpop.f32.mrb[31].mxu1 }
 0x242   :  { %v1561_v37 = vpop.f32.mrb[34].mxu0  ;;  %v1765_v54 = vsel %vm1731_vm5, %v3348_v35, -inf }
 0x243   :  { %v3350_v40 = vsel %vm1721_vm2, -1e+09, %v1561_v37  ;;  %v2726_v42 = vpop.f32.mrb[35].mxu0 }
 0x244   :  { %v1774_v44 = vsel %vm1731_vm5, %v3350_v40, -inf  ;;  %v1491_v46 = vpop.f32.mrb[32].mxu1 }
 0x245   :  { %1766 = vmax.xlane.f32.xlu1 %v1765_v54  ;;  %1775 = vmax.xlane.f32.xlu0 %v1774_v44  ;;  %v3356_v48 = vsel %vm1720_vm3, -1e+09, %v1491_v46  ;;  %v2721_v50 = vpop.f32.mrb[33].mxu1 }
 0x246   :  { %v1771_v52 = vsel %vm1731_vm5, %v3356_v48, -inf }
 0x248   :  { %v1631_v53 = vpop.f32.mrb[34].mxu1 }
 0x249   :  { %1772 = vmax.xlane.f32.xlu1 %v1771_v52  ;;  %v3360_v56 = vsel %vm1722_vm4, -1e+09, %v1631_v53  ;;  %v2731_v57 = vpop.f32.mrb[35].mxu1 }
 0x24a   :  { %v1777_v58 = vsel %vm1731_vm5, %v3360_v56, -inf }
 0x24d   :  { %1778 = vmax.xlane.f32.xlu1 %v1777_v58 }
 0x2aa   :  { %v1734_v59 = vpop.xlane.xlu0 %1733 }
 0x2ae   :  { %v1737_v60 = vpop.xlane.xlu0 %1736 }
 0x2b2   :  { %v1740_v61 = vpop.xlane.xlu0 %1739 }
 0x2b6   :  { %v1743_v62 = vpop.xlane.xlu1 %1742 }
 0x2ba   :  { %v1746_v3 = vpop.xlane.xlu0 %1745 }
 0x2be   :  { %v1749_v1 = vpop.xlane.xlu1 %1748 }
 0x2c2   :  { %v1752_v4 = vpop.xlane.xlu0 %1751 }
 0x2c6   :  { %v1758_v5 = vpop.xlane.xlu1 %1757 }
 0x2c7   :  { %v1780_v6 = vmax.f32 %v1734_v59, %v1758_v5 }
 0x2c9   :  { %v1788_v7 = vsub.f32 %v3287_v63, %v1780_v6  ;;  %v1812_v9 = vsub.f32 %v3324_v2, %v1780_v6 }
 0x2ca   :  { %v1755_v11 = vpop.xlane.xlu1 %1754  ;;  %v1764_v12 = vpop.xlane.xlu0 %1763 }
 0x2cb   :  { %v1820_v13 = vmul.f32 1.442695, %v1812_v9  ;;  %v1782_v15 = vmax.f32 %v1740_v61, %v1764_v12  ;;  %v1796_v17 = vmul.f32 1.442695, %v1788_v7 }
 0x2cd   :  { %v1790_v18 = vsub.f32 %v3297_v14, %v1782_v15  ;;  %v1814_v19 = vsub.f32 %v3332_v16, %v1782_v15  ;;  %2883 = vpow2.f32 %v1820_v13 }
 0x2ce   :  { %v1761_v20 = vpop.xlane.xlu1 %1760  ;;  %v1770_v21 = vpop.xlane.xlu0 %1769  ;;  %2885 = vpow2.f32 %v1796_v17 }
 0x2cf   :  { %v1824_v23 = vmul.f32 1.442695, %v1814_v19  ;;  %v1781_v25 = vmax.f32 %v1737_v60, %v1761_v20  ;;  %v1784_v26 = vmax.f32 %v1746_v3, %v1770_v21  ;;  %v1800_v27 = vmul.f32 1.442695, %v1790_v18 }
 0x2d1   :  { %v1789_v63 = vsub.f32 %v3292_v8, %v1781_v25  ;;  %v1813_v2 = vsub.f32 %v3339_v24, %v1781_v25  ;;  %v1792_v30 = vsub.f32 %v3307_v29, %v1784_v26  ;;  %2887 = vpow2.f32 %v1824_v23 }
 0x2d2   :  { %v1816_v31 = vsub.f32 %v3341_v28, %v1784_v26  ;;  %v1767_v14 = vpop.xlane.xlu1 %1766  ;;  %v1776_v32 = vpop.xlane.xlu0 %1775  ;;  %2889 = vpow2.f32 %v1800_v27 }
 0x2d3   :  { %v1798_v16 = vmul.f32 1.442695, %v1789_v63  ;;  %v1822_v33 = vmul.f32 1.442695, %v1813_v2  ;;  %v1804_v34 = vmul.f32 1.442695, %v1792_v30  ;;  %v1783_v36 = vmax.f32 %v1743_v62, %v1767_v14 }
 0x2d4   :  { %v1828_v37 = vmul.f32 1.442695, %v1816_v31  ;;  %v1786_v39 = vmax.f32 %v1752_v4, %v1776_v32 }
 0x2d5   :  { %2891 = vpow2.f32 %v1798_v16  ;;  %v1791_v42 = vsub.f32 %v3302_v22, %v1783_v36  ;;  %v1815_v8 = vsub.f32 %v3348_v35, %v1783_v36 }
 0x2d6   :  { %2893 = vpow2.f32 %v1822_v33  ;;  %v1794_v29 = vsub.f32 %v3318_v55, %v1786_v39  ;;  %v1818_v24 = vsub.f32 %v3350_v40, %v1786_v39  ;;  %v1773_v28 = vpop.xlane.xlu1 %1772 }
 0x2d7   :  { %2895 = vpow2.f32 %v1804_v34  ;;  %v1802_v54 = vmul.f32 1.442695, %v1791_v42  ;;  %v1826_v44 = vmul.f32 1.442695, %v1815_v8  ;;  %v1785_v46 = vmax.f32 %v1749_v1, %v1773_v28  ;;  %v2884_v50 = vpop.eup %2883 }
 0x2d8   :  { %2897 = vpow2.f32 %v1828_v37  ;;  %v1832_v52 = vmul.f32 1.442695, %v1818_v24  ;;  %v1808_v53 = vmul.f32 1.442695, %v1794_v29  ;;  %v1836_v58 = vmul.f32 0.5, %v2884_v50  ;;  %v2886_v59 = vpop.eup %2885 }
 0x2d9   :  { %v1793_v57 = vsub.f32 %v3312_v38, %v1785_v46  ;;  %v1817_v22 = vsub.f32 %v3356_v48, %v1785_v46  ;;  %2899 = vpow2.f32 %v1826_v44 }
 0x2da   :  { %v1779_v35 = vpop.xlane.xlu1 %1778  ;;  %2901 = vpow2.f32 %v1802_v54  ;;  %v3378_v62 = vadd.f32 %v2886_v59, %v1836_v58 }
 0x2db   :  { %v1830_v55 = vmul.f32 1.442695, %v1817_v22  ;;  %v1787_v40 = vmax.f32 %v1755_v11, %v1779_v35  ;;  %v2888_v60 = vpop.eup %2887  ;;  %2903 = vpow2.f32 %v1832_v52  ;;  %v1806_v61 = vmul.f32 1.442695, %v1793_v57 }
 0x2dc   :  { %2905 = vpow2.f32 %v1808_v53  ;;  %v1838_v38 = vmul.f32 0.5, %v2888_v60  ;;  %v2890_v4 = vpop.eup %2889  ;;  %v1852_v48 = vsel %vm1731_vm5, %v3378_v62, 0.0 }
 0x2dd   :  { %v1795_v1 = vsub.f32 %v3330_v10, %v1787_v40  ;;  %v1819_v3 = vsub.f32 %v3360_v56, %v1787_v40  ;;  %2907 = vpow2.f32 %v1830_v55  ;;  %1853 = vadd.xlane.f32.xlu0 %v1852_v48 }
 0x2de   :  { %v1846_v7 = vadd.f32 %v2890_v4, %v1838_v38  ;;  %2909 = vpow2.f32 %v1806_v61 }
 0x2df   :  { %v2892_v5 = vpop.eup %2891  ;;  %v1834_v6 = vmul.f32 1.442695, %v1819_v3  ;;  %v1810_v11 = vmul.f32 1.442695, %v1795_v1 }
 0x2e0   :  { %v2894_v9 = vpop.eup %2893  ;;  %v1858_v13 = vsel %vm1731_vm5, %v1846_v7, 0.0 }
 0x2e1   :  { %v2896_v12 = vpop.eup %2895  ;;  %v1837_v15 = vmul.f32 0.5, %v2894_v9  ;;  %2911 = vpow2.f32 %v1834_v6  ;;  %1859 = vadd.xlane.f32.xlu0 %v1858_v13 }
 0x2e2   :  { %v2898_v10 = vpop.eup %2897  ;;  %2913 = vpow2.f32 %v1810_v11 }
 0x2e3   :  { %v1845_v56 = vadd.f32 %v2892_v5, %v1837_v15  ;;  %v1840_v17 = vmul.f32 0.5, %v2898_v10  ;;  %v2900_v18 = vpop.eup %2899 }
 0x2e4   :  { %v2902_v19 = vpop.eup %2901  ;;  %v1839_v23 = vmul.f32 0.5, %v2900_v18 }
 0x2e5   :  { %v1855_v20 = vsel %vm1731_vm5, %v1845_v56, 0.0  ;;  %v1848_v21 = vadd.f32 %v2896_v12, %v1840_v17  ;;  %v2904_v25 = vpop.eup %2903 }
 0x2e6   :  { %1856 = vadd.xlane.f32.xlu1 %v1855_v20  ;;  %v2906_v26 = vpop.eup %2905  ;;  %v1847_v63 = vadd.f32 %v2902_v19, %v1839_v23  ;;  %v1842_v2 = vmul.f32 0.5, %v2904_v25 }
 0x2e7   :  { %v1864_v27 = vsel %vm1731_vm5, %v1848_v21, 0.0  ;;  %v2908_v30 = vpop.eup %2907 }
 0x2e8   :  { %1865 = vadd.xlane.f32.xlu0 %v1864_v27  ;;  %v1861_v31 = vsel %vm1731_vm5, %v1847_v63, 0.0  ;;  %v1850_v14 = vadd.f32 %v2906_v26, %v1842_v2  ;;  %v1841_v32 = vmul.f32 0.5, %v2908_v30  ;;  %v2910_v16 = vpop.eup %2909 }
 0x2ea   :  { %1862 = vadd.xlane.f32.xlu1 %v1861_v31  ;;  %v1870_v33 = vsel %vm1731_vm5, %v1850_v14, 0.0  ;;  %v3389_v34 = vadd.f32 %v2910_v16, %v1841_v32 }
 0x2eb   :  { %v2912_v36 = vpop.eup %2911 }
 0x2ec   :  { %1871 = vadd.xlane.f32.xlu0 %v1870_v33  ;;  %v1867_v37 = vsel %vm1731_vm5, %v3389_v34, 0.0  ;;  %v1843_v39 = vmul.f32 0.5, %v2912_v36  ;;  %v2914_v42 = vpop.eup %2913 }
 0x2ee   :  { %1868 = vadd.xlane.f32.xlu1 %v1867_v37  ;;  %v3393_v8 = vadd.f32 %v2914_v42, %v1843_v39 }
 0x2f0   :  { %v1873_v29 = vsel %vm1731_vm5, %v3393_v8, 0.0 }
 0x2f2   :  { %1874 = vadd.xlane.f32.xlu1 %v1873_v29 }
 0x36a   :  { %v1854_v24 = vpop.xlane.xlu0 %1853 }
 0x36b   :  { %2915 = vrcp.f32 %v1854_v24 }
 0x36e   :  { %v1860_v28 = vpop.xlane.xlu0 %1859 }
 0x36f   :  { %2917 = vrcp.f32 %v1860_v28 }
 0x373   :  { %v1857_v54 = vpop.xlane.xlu1 %1856 }
 0x374   :  { %2919 = vrcp.f32 %v1857_v54 }
 0x375   :  { %v1866_v44 = vpop.xlane.xlu0 %1865  ;;  %v2916_v46 = vpop.eup %2915 }
 0x376   :  { %2921 = vrcp.f32 %v1866_v44  ;;  %v1884_v52 = vmul.f32 %v2916_v46, %v3378_v62 }
 0x377   :  { %v1863_v50 = vpop.xlane.xlu1 %1862 }
 0x378   :  { %2923 = vrcp.f32 %v1863_v50  ;;  %2484 = vst.msk [vmem:[#allocation11] sm:$0xff] %vm1731_vm5, %v1884_v52  ;;  %2735 = vmatmul.mubr.msk.f32.vlgmr.msra.gmra.mrb[36].mxu0 %vm1731_vm5, %v1884_v52 }
 0x379   :  { %v1872_v53 = vpop.xlane.xlu0 %1871  ;;  %v2918_v57 = vpop.eup %2917  ;;  %2743 = vmatpush3.msra.mxu0 %v3274_v43  ;;  %2744 = vmatprep.mubr.msk.f32.mxu0 %vm3084_vm0, %v3083_v0 }
 0x37a   :  { %2925 = vrcp.f32 %v1872_v53  ;;  %v1886_v58 = vmul.f32 %v2918_v57, %v1846_v7  ;;  %2752 = vmatprep.subr.mxu0 %v3083_v0 }
 0x37b   :  { %v1869_v22 = vpop.xlane.xlu1 %1868 }
 0x37c   :  { %2927 = vrcp.f32 %v1869_v22  ;;  %2486 = vst.msk [vmem:[#allocation11 + $0x10] sm:$0xff] %vm1731_vm5, %v1886_v58  ;;  %2745 = vmatmul.mubr.msk.f32.vlgmr.msra.gmra.mrb[38].mxu0 %vm1731_vm5, %v1886_v58 }
 0x37d   :  { %2753 = vmatpush3.msra.mxu0 %v3278_v47  ;;  %2754 = vmatprep.mubr.msk.f32.mxu0 %vm3084_vm0, %v3083_v0 }
 0x37e   :  { %v2920_v35 = vpop.eup %2919  ;;  %2762 = vmatprep.subr.mxu0 %v3083_v0 }
 0x37f   :  { %v1885_v59 = vmul.f32 %v2920_v35, %v1845_v56  ;;  %v1875_v55 = vpop.xlane.xlu1 %1874 }
 0x380   :  { %v2922_v43 = vpop.eup %2921  ;;  %2929 = vrcp.f32 %v1875_v55 }
 0x381   :  { %2485 = vst.msk [vmem:[#allocation11 + $0x8] sm:$0xff] %vm1731_vm5, %v1885_v59  ;;  %v1888_v40 = vmul.f32 %v2922_v43, %v1848_v21  ;;  %2740 = vmatmul.mubr.msk.f32.vlgmr.msra.gmra.mrb[36].mxu1 %vm1731_vm5, %v1885_v59 }
 0x382   :  { %v2924_v60 = vpop.eup %2923  ;;  %2748 = vmatpush3.msra.mxu1 %v3270_v41  ;;  %2749 = vmatprep.mubr.msk.f32.mxu1 %vm3084_vm0, %v3083_v0 }
 0x383   :  { %2488 = vst.msk [vmem:[#allocation11 + $0x20] sm:$0xff] %vm1731_vm5, %v1888_v40  ;;  %v1887_v47 = vmul.f32 %v2924_v60, %v1847_v63  ;;  %2755 = vmatmul.mubr.msk.f32.vlgmr.msra.gmra.mrb[40].mxu0 %vm1731_vm5, %v1888_v40  ;;  %2757 = vmatprep.subr.mxu1 %v3083_v0 }
 0x384   :  { %v2926_v61 = vpop.eup %2925  ;;  %2763 = vmatpush3.msra.mxu0 %v3282_v51  ;;  %2764 = vmatprep.mubr.msk.f32.mxu0 %vm3084_vm0, %v3083_v0 }
 0x385   :  { %2487 = vst.msk [vmem:[#allocation11 + $0x18] sm:$0xff] %vm1731_vm5, %v1887_v47  ;;  %v1890_v62 = vmul.f32 %v2926_v61, %v1850_v14  ;;  %2750 = vmatmul.mubr.msk.f32.vlgmr.msra.gmra.mrb[38].mxu1 %vm1731_vm5, %v1887_v47 }
 0x386   :  { %v2928_v41 = vpop.eup %2927  ;;  %2758 = vmatpush3.msra.mxu1 %v3276_v45  ;;  %2759 = vmatprep.mubr.msk.f32.mxu1 %vm3084_vm0, %v3083_v0 }
 0x387   :  { %2490 = vst.msk [vmem:[#allocation11 + $0x30] sm:$0xff] %vm1731_vm5, %v1890_v62  ;;  %v1889_v1 = vmul.f32 %v2928_v41, %v3389_v34  ;;  %2765 = vmatmul.mubr.msk.f32.vlgmr.msra.gmra.mrb[42].mxu0 %vm1731_vm5, %v1890_v62  ;;  %2767 = vmatprep.subr.mxu1 %v3083_v0 }
 0x389   :  { %2489 = vst.msk [vmem:[#allocation11 + $0x28] sm:$0xff] %vm1731_vm5, %v1889_v1  ;;  %2760 = vmatmul.mubr.msk.f32.vlgmr.msra.gmra.mrb[40].mxu1 %vm1731_vm5, %v1889_v1 }
 0x38a   :  { %v2930_v51 = vpop.eup %2929  ;;  %2768 = vmatpush3.msra.mxu1 %v3280_v49  ;;  %2769 = vmatprep.mubr.msk.f32.mxu1 %vm3084_vm0, %v3083_v0 }
 0x38b   :  { %v1891_v45 = vmul.f32 %v2930_v51, %v3393_v8 }
 0x38d   :  { %2491 = vst.msk [vmem:[#allocation11 + $0x38] sm:$0xff] %vm1731_vm5, %v1891_v45  ;;  %2770 = vmatmul.mubr.msk.f32.vlgmr.msra.gmra.mrb[42].mxu1 %vm1731_vm5, %v1891_v45 }
 0x38e   :  { %3030 = shalt.err (!%p3027_p8)
}
 0x38f   :  { %s3031_s30 = scalar_lea.hbm %s3474_s6, 1024 }
 0x390   :  { %p3032_p9 = scmp.ne.s32.totalorder %s3474_s6, %s3031_s30  ;;  %p3035_p10 = scmp.lt.u32.totalorder %s3031_s30, %s3474_s6 }
 0x392   :  { %p3037_p11 = pnand %p3035_p10, %p3032_p9 }
 0x394   :  { %3040 = shalt.err (!%p3037_p11)
}
 0x395   :  { %2515 = dma.vmem_to_hbm [thread:$0]  %s2510_s26, 1024, %s3474_s6, [#allocation12], %s3077_s1, %s3077_s1, %s3078_s21  }
 0x396   :  { %s3087_s6 = smov [#allocation10]  }
 0x397   :  { %s2497_s14 = sshll.u32 %s3087_s6, 4  ;;  %s2498_s14 = int_to_ptr.vmem [resolvable:$true] %s2497_s14 }
 0x398   :  { %s3041_s15 = scalar_lea.vmem %s2498_s14, 1024  ;;  %p3046_p13 = scmp.lt.s32.totalorder %s2498_s14, %s2498_s14 }
 0x399   :  { %p3042_p12 = scmp.ne.s32.totalorder %s2498_s14, %s3041_s15  ;;  %p3047_p0 = scmp.lt.s32.totalorder %s3041_s15, %s3041_s15 }
 0x39b   :  { %p3048_p1 = por %p3047_p0, %p3046_p13 }
 0x39d   :  { %p3049_p2 = pnand %p3048_p1, %p3042_p12 }
 0x44b   :  { %v1961_v0 = vpop.f32.mrb[36].mxu0 }
 0x44c   :  { %2476 = vst [vmem:[#allocation10] sm:$0xff] %v1961_v0  ;;  %v2736_v49 = vpop.f32.mrb[37].mxu0 }
 0x44f   :  { %v2107_v3 = vpop.f32.mrb[38].mxu0 }
 0x450   :  { %2478 = vst [vmem:[#allocation10 + $0x10] sm:$0xff] %v2107_v3  ;;  %v2746_v38 = vpop.f32.mrb[39].mxu0 }
 0x454   :  { %v2034_v4 = vpop.f32.mrb[36].mxu1 }
 0x455   :  { %2477 = vst [vmem:[#allocation10 + $0x8] sm:$0xff] %v2034_v4  ;;  %v2741_v48 = vpop.f32.mrb[37].mxu1 }
 0x456   :  { %v2253_v5 = vpop.f32.mrb[40].mxu0 }
 0x457   :  { %2480 = vst [vmem:[#allocation10 + $0x20] sm:$0xff] %v2253_v5  ;;  %v2756_v6 = vpop.f32.mrb[41].mxu0 }
 0x458   :  { %v2180_v7 = vpop.f32.mrb[38].mxu1 }
 0x459   :  { %2479 = vst [vmem:[#allocation10 + $0x18] sm:$0xff] %v2180_v7  ;;  %v2751_v9 = vpop.f32.mrb[39].mxu1 }
 0x45a   :  { %v2399_v11 = vpop.f32.mrb[42].mxu0 }
 0x45b   :  { %2482 = vst [vmem:[#allocation10 + $0x30] sm:$0xff] %v2399_v11  ;;  %v2766_v12 = vpop.f32.mrb[43].mxu0 }
 0x45c   :  { %v2326_v13 = vpop.f32.mrb[40].mxu1 }
 0x45d   :  { %2481 = vst [vmem:[#allocation10 + $0x28] sm:$0xff] %v2326_v13  ;;  %v2761_v15 = vpop.f32.mrb[41].mxu1 }
 0x460   :  { %v2472_v10 = vpop.f32.mrb[42].mxu1 }
 0x461   :  { %2483 = vst [vmem:[#allocation10 + $0x38] sm:$0xff] %v2472_v10  ;;  %v2771_v56 = vpop.f32.mrb[43].mxu1 }
 0x462   :  { %3052 = shalt.err (!%p3049_p2)
}
 0x463   :  { %s3053_s18 = scalar_lea.hbm %s3473_s5, 1024 }
 0x464   :  { %p3054_p3 = scmp.ne.s32.totalorder %s3473_s5, %s3053_s18  ;;  %p3057_p4 = scmp.lt.u32.totalorder %s3053_s18, %s3473_s5 }
 0x466   :  { %p3059_p5 = pnand %p3057_p4, %p3054_p3 }
 0x468   :  { %3062 = shalt.err (!%p3059_p5)
}
 0x469   :  { %2503 = dma.vmem_to_hbm [thread:$0]  %s2498_s14, 1024, %s3473_s5, [#allocation4], %s3077_s1, %s3077_s1, %s3078_s21  }
 0x46a   :  { %3069 = dma.done.wait [#allocation4], 1024  }
 0x46b   :  { %3070 = vsyncadd [#allocation4], 4294966272 }
 0x46c   :  { %3071 = dma.done.wait [#allocation12], 1024  }
 0x46d   :  { %3072 = vsyncadd [#allocation12], 4294966272 }
 0x46e   :  { %2522 = vsyncpa [#allocation3], 1 }
 0x46f   :  { %2523 = vsyncpa [#allocation6], 1 }
 0x470   :  { %2524 = vsyncpa [#allocation9], 1 }
 0x471   :  { %2525 = vsyncpa [#allocation4], 1 }
 0x472   :  { %2526 = vsyncpa [#allocation12], 1 }

</bundles_post_ra>
